<compile_context>
chip_gen: v7x
topology: tpu7x:2x2x1
jax: 0.10.0
libtpu: 0.0.40
codegen_flags: <defaults>
</compile_context>

<pallas_src>
import functools

import jax
import jax.numpy as jnp
from jax.experimental import pallas as pl
from jax.experimental.pallas import tpu as pltpu

LANE = 128  # lane-dense head / output width (one full vreg row)


def ffn_kernel(obs_ref, w1_ref, b1_ref, w2_ref, b2_ref, wh_ref, bh_ref,
               out_ref, *, out_dim):
    x = obs_ref[...]

    # layer1 + ReLU (bf16 MXU inputs, f32 accumulate, f32 elementwise)
    h = jnp.dot(x, w1_ref[...], preferred_element_type=jnp.float32) + b1_ref[...]
    h = jnp.maximum(h, 0.0)

    # layer2 + ReLU
    h = jnp.dot(h.astype(w2_ref.dtype), w2_ref[...],
                preferred_element_type=jnp.float32) + b2_ref[...]
    h = jnp.maximum(h, 0.0)

    # fused policy + value head: one lane-dense (hidden, 128) matmul.
    #   lanes [0, out_dim)   -> policy logits
    #   lane  out_dim        -> value
    #   lanes > out_dim      -> zero padding (zero weights / zero bias)
    head = jnp.dot(h.astype(wh_ref.dtype), wh_ref[...],
                   preferred_element_type=jnp.float32) + bh_ref[...]

    lane = jax.lax.broadcasted_iota(jnp.int32, head.shape, dimension=1)
    is_logit = lane < out_dim

    # logsumexp over the real logit lanes only (padding masked to -inf)
    logits = jnp.where(is_logit, head, -jnp.inf)
    m = jnp.max(logits, axis=-1, keepdims=True)
    lse = m + jnp.log(jnp.sum(jnp.exp(logits - m), axis=-1, keepdims=True))

    # lane-dense output slab: normalized log-probs in the logit lanes,
    # raw head (value / zero padding) everywhere else.
    out_ref[...] = jnp.where(is_logit, head - lse, head)


def _round_up(x, m):
    return (x + m - 1) // m * m


def feed_forward_nn(obs, params, *, compute_dtype=jnp.bfloat16, max_tile=512):
    """obs: [B, in_dim] f32. params: (in,out)-layout weights, (1,out) biases."""
    B, in_dim = obs.shape
    hidden = params["w1"].shape[1]
    out_dim = params["wp"].shape[1]

    # --- fuse policy + value heads into one lane-dense (hidden, LANE) weight ---
    wh = jnp.zeros((hidden, LANE), jnp.float32)
    wh = wh.at[:, :out_dim].set(params["wp"])
    wh = wh.at[:, out_dim:out_dim + 1].set(params["wv"])
    bh = jnp.zeros((1, LANE), jnp.float32)
    bh = bh.at[:, :out_dim].set(params["bp"])
    bh = bh.at[:, out_dim:out_dim + 1].set(params["bv"])

    # --- bf16 MXU inputs (f32 accumulate inside the kernel, biases stay f32) ---
    obs_c = obs.astype(compute_dtype)
    w1 = params["w1"].astype(compute_dtype)
    w2 = params["w2"].astype(compute_dtype)
    wh = wh.astype(compute_dtype)
    b1 = params["b1"].astype(jnp.float32)
    b2 = params["b2"].astype(jnp.float32)
    bh = bh.astype(jnp.float32)

    # --- batch tiling: modest tile keeps double-buffered DMA well under VMEM
    #     even on v7x (64 MiB physical / 32 MiB scoped default). ---
    TB = min(max_tile, _round_up(B, 8))
    grid = (pl.cdiv(B, TB),)

    def tiled(shape):       # batch-tiled arrays: block moves with grid index
        return pl.BlockSpec(shape, lambda i: (i, 0))

    def resident(shape):    # weights / biases: block index never changes
        return pl.BlockSpec(shape, lambda i: (0, 0))

    flops = 2 * B * (in_dim * hidden + hidden * hidden + hidden * LANE)
    bytes_accessed = (
        obs_c.size * obs_c.dtype.itemsize
        + B * LANE * 4
        + sum(a.size * a.dtype.itemsize for a in (w1, b1, w2, b2, wh, bh)))

    out = pl.pallas_call(
        functools.partial(ffn_kernel, out_dim=out_dim),
        out_shape=jax.ShapeDtypeStruct((B, LANE), jnp.float32),
        grid=grid,
        in_specs=[tiled((TB, in_dim)),
                  resident((in_dim, hidden)), resident((1, hidden)),
                  resident((hidden, hidden)), resident((1, hidden)),
                  resident((hidden, LANE)), resident((1, LANE))],
        out_specs=tiled((TB, LANE)),
        compiler_params=pltpu.CompilerParams(
            dimension_semantics=("parallel",)),
        cost_estimate=pl.CostEstimate(
            flops=flops,
            transcendentals=B * (LANE + 1),
            bytes_accessed=bytes_accessed),
    )(obs_c, w1, b1, w2, b2, wh, bh)

    logp = out[:, :out_dim]
    value = out[:, out_dim:out_dim + 1]
    return logp, value


def init_params(key, in_dim=64, out_dim=4, hidden=64):
    """Deterministic PyTorch-Linear-style init (uniform +-1/sqrt(fan_in)),
    weights stored as (in, out)."""
    ks = jax.random.split(key, 8)

    def linear(kw, kb, fan_in, fan_out):
        bound = 1.0 / jnp.sqrt(jnp.float32(fan_in))
        w = jax.random.uniform(kw, (fan_in, fan_out), jnp.float32, -bound, bound)
        b = jax.random.uniform(kb, (1, fan_out), jnp.float32, -bound, bound)
        return w, b

    w1, b1 = linear(ks[0], ks[1], in_dim, hidden)
    w2, b2 = linear(ks[2], ks[3], hidden, hidden)
    wp, bp = linear(ks[4], ks[5], hidden, out_dim)
    wv, bv = linear(ks[6], ks[7], hidden, 1)
    return dict(w1=w1, b1=b1, w2=w2, b2=b2, wp=wp, bp=bp, wv=wv, bv=bv)


def _reference(obs, p, compute_dtype=jnp.bfloat16):
    """Mirrors the kernel's bf16-in / f32-accumulate numerics."""
    cd = compute_dtype
    h = jnp.maximum(jnp.dot(obs.astype(cd), p["w1"].astype(cd),
                            preferred_element_type=jnp.float32) + p["b1"], 0.0)
    h = jnp.maximum(jnp.dot(h.astype(cd), p["w2"].astype(cd),
                            preferred_element_type=jnp.float32) + p["b2"], 0.0)
    logits = jnp.dot(h.astype(cd), p["wp"].astype(cd),
                     preferred_element_type=jnp.float32) + p["bp"]
    logp = logits - jax.scipy.special.logsumexp(logits, axis=-1, keepdims=True)
    value = jnp.dot(h.astype(cd), p["wv"].astype(cd),
                    preferred_element_type=jnp.float32) + p["bv"]
    return logp, value


if __name__ == "__main__":
    key = jax.random.PRNGKey(0)
    k_obs, k_params = jax.random.split(key)

    B, IN_DIM, OUT_DIM, HIDDEN = 8, 64, 4, 64
    obs = jax.random.normal(k_obs, (B, IN_DIM), dtype=jnp.float32)
    params = init_params(k_params, IN_DIM, OUT_DIM, HIDDEN)

    logp, value = feed_forward_nn(obs, params)
    jax.block_until_ready((logp, value))

    ref_logp, ref_value = _reference(obs, params)
    assert logp.shape == (B, OUT_DIM) and value.shape == (B, 1)
    assert jnp.allclose(logp, ref_logp, atol=1e-2, rtol=1e-2)
    assert jnp.allclose(value, ref_value, atol=1e-2, rtol=1e-2)
    # TODO(synk): torch.distributions.Categorical object itself has no Pallas
    # equivalent; the kernel returns its normalized log-probs instead.
    print("KERNEL_OK")
</pallas_src>

<mosaic_0001>
module attributes {stable_mosaic.version = 11 : i64} {
  func.func @ffn_kernel(%arg0: i32, %arg1: memref<8x64xbf16, #tpu.memory_space<vmem>>, %arg2: memref<64x64xbf16, #tpu.memory_space<vmem>>, %arg3: memref<1x64xf32, #tpu.memory_space<vmem>>, %arg4: memref<64x64xbf16, #tpu.memory_space<vmem>>, %arg5: memref<1x64xf32, #tpu.memory_space<vmem>>, %arg6: memref<64x128xbf16, #tpu.memory_space<vmem>>, %arg7: memref<1x128xf32, #tpu.memory_space<vmem>>, %arg8: memref<8x128xf32, #tpu.memory_space<vmem>>) attributes {dimension_semantics = [#tpu.dimension_semantics<parallel>], iteration_bounds = array<i64: 1>, scalar_prefetch = 0 : i64, scratch_operands = 0 : i64, tpu.core_type = #tpu.core_type<tc>, window_params = [{transform_indices = @transform_0, window_bounds = array<i64: 8, 64>}, {pipeline_mode = #tpu.pipeline_mode<synchronous>, transform_indices = @transform_1, window_bounds = array<i64: 64, 64>}, {pipeline_mode = #tpu.pipeline_mode<synchronous>, transform_indices = @transform_2, window_bounds = array<i64: 1, 64>}, {pipeline_mode = #tpu.pipeline_mode<synchronous>, transform_indices = @transform_3, window_bounds = array<i64: 64, 64>}, {pipeline_mode = #tpu.pipeline_mode<synchronous>, transform_indices = @transform_4, window_bounds = array<i64: 1, 64>}, {pipeline_mode = #tpu.pipeline_mode<synchronous>, transform_indices = @transform_5, window_bounds = array<i64: 64, 128>}, {pipeline_mode = #tpu.pipeline_mode<synchronous>, transform_indices = @transform_6, window_bounds = array<i64: 1, 128>}, {transform_indices = @transform_7, window_bounds = array<i64: 8, 128>}]} {
    %c0 = arith.constant 0 : index
    %c0_0 = arith.constant 0 : index
    %0 = vector.load %arg1[%c0, %c0_0] : memref<8x64xbf16, #tpu.memory_space<vmem>>, vector<8x64xbf16>
    %c0_1 = arith.constant 0 : index
    %c0_2 = arith.constant 0 : index
    %1 = vector.load %arg2[%c0_1, %c0_2] : memref<64x64xbf16, #tpu.memory_space<vmem>>, vector<64x64xbf16>
    %cst = arith.constant dense<0.000000e+00> : vector<8x64xf32>
    %2 = tpu.matmul %0, %1, %cst {dimension_numbers = #tpu.dot_dimension_numbers<[1], [0], [0], [1], [0, 0, 1, 1], [], []>} : vector<8x64xbf16>, vector<64x64xbf16>, vector<8x64xf32> -> vector<8x64xf32>
    %c0_3 = arith.constant 0 : index
    %c0_4 = arith.constant 0 : index
    %3 = vector.load %arg3[%c0_3, %c0_4] : memref<1x64xf32, #tpu.memory_space<vmem>>, vector<1x64xf32>
    %4 = vector.broadcast %3 : vector<1x64xf32> to vector<8x64xf32>
    %5 = arith.addf %2, %4 : vector<8x64xf32>
    %cst_5 = arith.constant 0.000000e+00 : f32
    %6 = vector.broadcast %cst_5 : f32 to vector<8x64xf32>
    %7 = arith.maximumf %5, %6 : vector<8x64xf32>
    %8 = arith.truncf %7 : vector<8x64xf32> to vector<8x64xbf16>
    %c0_6 = arith.constant 0 : index
    %c0_7 = arith.constant 0 : index
    %9 = vector.load %arg4[%c0_6, %c0_7] : memref<64x64xbf16, #tpu.memory_space<vmem>>, vector<64x64xbf16>
    %cst_8 = arith.constant dense<0.000000e+00> : vector<8x64xf32>
    %10 = tpu.matmul %8, %9, %cst_8 {dimension_numbers = #tpu.dot_dimension_numbers<[1], [0], [0], [1], [0, 0, 1, 1], [], []>} : vector<8x64xbf16>, vector<64x64xbf16>, vector<8x64xf32> -> vector<8x64xf32>
    %c0_9 = arith.constant 0 : index
    %c0_10 = arith.constant 0 : index
    %11 = vector.load %arg5[%c0_9, %c0_10] : memref<1x64xf32, #tpu.memory_space<vmem>>, vector<1x64xf32>
    %12 = vector.broadcast %11 : vector<1x64xf32> to vector<8x64xf32>
    %13 = arith.addf %10, %12 : vector<8x64xf32>
    %cst_11 = arith.constant 0.000000e+00 : f32
    %14 = vector.broadcast %cst_11 : f32 to vector<8x64xf32>
    %15 = arith.maximumf %13, %14 : vector<8x64xf32>
    %16 = arith.truncf %15 : vector<8x64xf32> to vector<8x64xbf16>
    %c0_12 = arith.constant 0 : index
    %c0_13 = arith.constant 0 : index
    %17 = vector.load %arg6[%c0_12, %c0_13] : memref<64x128xbf16, #tpu.memory_space<vmem>>, vector<64x128xbf16>
    %cst_14 = arith.constant dense<0.000000e+00> : vector<8x128xf32>
    %18 = tpu.matmul %16, %17, %cst_14 {dimension_numbers = #tpu.dot_dimension_numbers<[1], [0], [0], [1], [0, 0, 1, 1], [], []>} : vector<8x64xbf16>, vector<64x128xbf16>, vector<8x128xf32> -> vector<8x128xf32>
    %c0_15 = arith.constant 0 : index
    %c0_16 = arith.constant 0 : index
    %19 = vector.load %arg7[%c0_15, %c0_16] : memref<1x128xf32, #tpu.memory_space<vmem>>, vector<1x128xf32>
    %20 = vector.broadcast %19 : vector<1x128xf32> to vector<8x128xf32>
    %21 = arith.addf %18, %20 : vector<8x128xf32>
    %22 = tpu.iota {dimensions = array<i32: 1>} : vector<8x128xi32>
    %c4_i32 = arith.constant 4 : i32
    %23 = vector.broadcast %c4_i32 : i32 to vector<8x128xi32>
    %24 = arith.cmpi slt, %22, %23 : vector<8x128xi32>
    %cst_17 = arith.constant 0xFF800000 : f32
    %25 = vector.broadcast %cst_17 : f32 to vector<8x128xf32>
    %26 = arith.select %24, %21, %25 : vector<8x128xi1>, vector<8x128xf32>
    %cst_18 = arith.constant dense<0xFF800000> : vector<8xf32>
    %27 = vector.multi_reduction <maximumf>, %26, %cst_18 [1] : vector<8x128xf32> to vector<8xf32>
    %28 = vector.shape_cast %27 : vector<8xf32> to vector<8x1xf32>
    %29 = vector.broadcast %28 : vector<8x1xf32> to vector<8x128xf32>
    %30 = arith.subf %26, %29 : vector<8x128xf32>
    %31 = math.exp %30 : vector<8x128xf32>
    %cst_19 = arith.constant dense<0.000000e+00> : vector<8xf32>
    %32 = vector.multi_reduction <add>, %31, %cst_19 [1] : vector<8x128xf32> to vector<8xf32>
    %33 = vector.shape_cast %32 : vector<8xf32> to vector<8x1xf32>
    %34 = math.log %33 : vector<8x1xf32>
    %35 = arith.addf %28, %34 : vector<8x1xf32>
    %36 = vector.broadcast %35 : vector<8x1xf32> to vector<8x128xf32>
    %37 = arith.subf %21, %36 : vector<8x128xf32>
    %38 = arith.select %24, %37, %21 : vector<8x128xi1>, vector<8x128xf32>
    %c0_20 = arith.constant 0 : index
    %c0_21 = arith.constant 0 : index
    %39 = vector.load %arg8[%c0_20, %c0_21] : memref<8x128xf32, #tpu.memory_space<vmem>>, vector<8x128xf32>
    tpu.vector_store %arg8[%c0_20, %c0_21], %38 {strides = array<i32>} : memref<8x128xf32, #tpu.memory_space<vmem>>, vector<8x128xf32>,
    return
  }
  func.func @transform_0(%arg0: i32) -> (i32, i32) {
    %c0_i32 = arith.constant 0 : i32
    %c0_i32_0 = arith.constant 0 : i32
    return %arg0, %c0_i32 : i32, i32
  }
  func.func @transform_1(%arg0: i32) -> (i32, i32) {
    %c0_i32 = arith.constant 0 : i32
    %c0_i32_0 = arith.constant 0 : i32
    %c0_i32_1 = arith.constant 0 : i32
    return %c0_i32, %c0_i32_0 : i32, i32
  }
  func.func @transform_2(%arg0: i32) -> (i32, i32) {
    %c0_i32 = arith.constant 0 : i32
    %c0_i32_0 = arith.constant 0 : i32
    %c0_i32_1 = arith.constant 0 : i32
    return %c0_i32, %c0_i32_0 : i32, i32
  }
  func.func @transform_3(%arg0: i32) -> (i32, i32) {
    %c0_i32 = arith.constant 0 : i32
    %c0_i32_0 = arith.constant 0 : i32
    %c0_i32_1 = arith.constant 0 : i32
    return %c0_i32, %c0_i32_0 : i32, i32
  }
  func.func @transform_4(%arg0: i32) -> (i32, i32) {
    %c0_i32 = arith.constant 0 : i32
    %c0_i32_0 = arith.constant 0 : i32
    %c0_i32_1 = arith.constant 0 : i32
    return %c0_i32, %c0_i32_0 : i32, i32
  }
  func.func @transform_5(%arg0: i32) -> (i32, i32) {
    %c0_i32 = arith.constant 0 : i32
    %c0_i32_0 = arith.constant 0 : i32
    %c0_i32_1 = arith.constant 0 : i32
    return %c0_i32, %c0_i32_0 : i32, i32
  }
  func.func @transform_6(%arg0: i32) -> (i32, i32) {
    %c0_i32 = arith.constant 0 : i32
    %c0_i32_0 = arith.constant 0 : i32
    %c0_i32_1 = arith.constant 0 : i32
    return %c0_i32, %c0_i32_0 : i32, i32
  }
  func.func @transform_7(%arg0: i32) -> (i32, i32) {
    %c0_i32 = arith.constant 0 : i32
    %c0_i32_0 = arith.constant 0 : i32
    return %arg0, %c0_i32 : i32, i32
  }
}

</mosaic_0001>

<bundles_post_ra>
// kernel: tpu_custom_call.1
= control target key start
LH: loop header
LB: loop body
LE: loop exit
PB: predicated region body
PF: predicated region fallthrough
CT: control target
= control target key end

     0   :  { %12 = vsyncpa [#allocation3], 0  ;;  %s714_s0 = inlined_call_operand.hbm [shape: bf16[8,64], index: 0, kind: input, shape index: {}]   ;;  %s715_s1 = inlined_call_operand.hbm [shape: bf16[64,64], index: 1, kind: input, shape index: {}]   ;;  %s716_s2 = inlined_call_operand.vmem [shape: f32[1,64], index: 2, kind: input, shape index: {}]   ;;  %s717_s3 = inlined_call_operand.hbm [shape: bf16[64,64], index: 3, kind: input, shape index: {}]   ;;  %s718_s4 = inlined_call_operand.vmem [shape: f32[1,64], index: 4, kind: input, shape index: {}]   ;;  %s719_s5 = inlined_call_operand.hbm [shape: bf16[64,128], index: 5, kind: input, shape index: {}]   ;;  %s720_s6 = inlined_call_operand.vmem [shape: f32[1,128], index: 6, kind: input, shape index: {}]   ;;  %s721_s7 = inlined_call_operand.hbm [shape: f32[8,128], index: 7, kind: output, shape index: {}]  }
   0x1   :  { %13 = vsyncpa [#allocation6], 0 }
   0x2   :  { %14 = vsyncpa [#allocation9], 0 }
   0x3   :  { %15 = vsyncpa [#allocation4], 0  ;;  %s579_s24 = smov [#allocation5]   ;;  %s461_s28 = scalar_lea.hbm %s715_s1, 512 }
   0x4   :  { %s31_s25 = sshll.u32 %s579_s24, 4  ;;  %p462_p0 = scmp.ne.s32.totalorder %s715_s1, %s461_s28  ;;  %s32_s25 = int_to_ptr.vmem [resolvable:$true] %s31_s25 }
   0x5   :  { %p465_p1 = scmp.lt.u32.totalorder %s461_s28, %s715_s1 }
   0x7   :  { %p467_p2 = pnand %p465_p1, %p462_p0 }
   0x9   :  { %470 = shalt.err (!%p467_p2)
}
   0xa   :  { %s471_s10 = scalar_lea.vmem %s32_s25, 512  ;;  %p476_p4 = scmp.lt.s32.totalorder %s32_s25, %s32_s25 }
   0xb   :  { %p472_p3 = scmp.ne.s32.totalorder %s32_s25, %s471_s10  ;;  %p477_p5 = scmp.lt.s32.totalorder %s471_s10, %s471_s10 }
   0xd   :  { %p478_p6 = por %p477_p5, %p476_p4 }
   0xf   :  { %p479_p7 = pnand %p478_p6, %p472_p3 }
  0x11   :  { %482 = shalt.err (!%p479_p7)
}
  0x12   :  { %s580_s11 = smov 64   ;;  %s581_s12 = smov 4  }
  0x13   :  { %37 = dma.hbm_to_vmem [thread:$0]  %s715_s1, 512, %s32_s25, [#allocation6], %s580_s11, %s580_s11, %s581_s12  }
  0x14   :  { %s582_s15 = smov [#allocation2]   ;;  %s583_s17 = smov [#allocation7]  }
  0x15   :  { %s22_s16 = sshll.u32 %s582_s15, 4  ;;  %s45_s18 = sshll.u32 %s583_s17, 4  ;;  %s23_s16 = int_to_ptr.vmem [resolvable:$true] %s22_s16  ;;  %s46_s18 = int_to_ptr.vmem [resolvable:$true] %s45_s18 }
  0x16   :  { %s483_s21 = scalar_lea.hbm %s714_s0, 64 }
  0x17   :  { %p484_p8 = scmp.ne.s32.totalorder %s714_s0, %s483_s21  ;;  %p487_p9 = scmp.lt.u32.totalorder %s483_s21, %s714_s0 }
  0x19   :  { %p489_p10 = pnand %p487_p9, %p484_p8 }
  0x1b   :  { %492 = shalt.err (!%p489_p10)
}
  0x1c   :  { %s493_s1 = scalar_lea.vmem %s23_s16, 64  ;;  %p498_p12 = scmp.lt.s32.totalorder %s23_s16, %s23_s16 }
  0x1d   :  { %p494_p11 = scmp.ne.s32.totalorder %s23_s16, %s493_s1  ;;  %p499_p13 = scmp.lt.s32.totalorder %s493_s1, %s493_s1 }
  0x1f   :  { %p500_p0 = por %p499_p13, %p498_p12 }
  0x21   :  { %p501_p1 = pnand %p500_p0, %p494_p11 }
  0x23   :  { %504 = shalt.err (!%p501_p1)
}
  0x24   :  { %25 = dma.hbm_to_vmem [thread:$0]  %s714_s0, 64, %s23_s16, [#allocation3]  }
  0x25   :  { %s505_s30 = scalar_lea.hbm %s717_s3, 512 }
  0x26   :  { %p506_p2 = scmp.ne.s32.totalorder %s717_s3, %s505_s30  ;;  %p509_p3 = scmp.lt.u32.totalorder %s505_s30, %s717_s3 }
  0x28   :  { %p511_p4 = pnand %p509_p3, %p506_p2 }
  0x2a   :  { %514 = shalt.err (!%p511_p4)
}
  0x2b   :  { %s515_s14 = scalar_lea.vmem %s46_s18, 512  ;;  %p520_p6 = scmp.lt.s32.totalorder %s46_s18, %s46_s18 }
  0x2c   :  { %p516_p5 = scmp.ne.s32.totalorder %s46_s18, %s515_s14  ;;  %p521_p7 = scmp.lt.s32.totalorder %s515_s14, %s515_s14 }
  0x2e   :  { %p522_p8 = por %p521_p7, %p520_p6 }
  0x30   :  { %p523_p9 = pnand %p522_p8, %p516_p5 }
  0x32   :  { %526 = shalt.err (!%p523_p9)
}
  0x33   :  { %51 = dma.hbm_to_vmem [thread:$0]  %s717_s3, 512, %s46_s18, [#allocation6], %s580_s11, %s580_s11, %s581_s12  }
  0x34   :  { %s584_s16 = smov [#allocation8]   ;;  %s527_s21 = scalar_lea.hbm %s719_s5, 512 }
  0x35   :  { %s59_s17 = sshll.u32 %s584_s16, 4  ;;  %p528_p10 = scmp.ne.s32.totalorder %s719_s5, %s527_s21  ;;  %s60_s17 = int_to_ptr.vmem [resolvable:$true] %s59_s17 }
  0x36   :  { %p531_p11 = scmp.lt.u32.totalorder %s527_s21, %s719_s5 }
  0x38   :  { %p533_p12 = pnand %p531_p11, %p528_p10 }
  0x3a   :  { %536 = shalt.err (!%p533_p12)
}
  0x3b   :  { %s537_s1 = scalar_lea.vmem %s60_s17, 512  ;;  %p542_p0 = scmp.lt.s32.totalorder %s60_s17, %s60_s17 }
  0x3c   :  { %p538_p13 = scmp.ne.s32.totalorder %s60_s17, %s537_s1  ;;  %p543_p1 = scmp.lt.s32.totalorder %s537_s1, %s537_s1 }
  0x3e   :  { %p544_p2 = por %p543_p1, %p542_p0 }
  0x40   :  { %p545_p3 = pnand %p544_p2, %p538_p13 }
  0x42   :  { %548 = shalt.err (!%p545_p3)
}
  0x43   :  { %65 = dma.hbm_to_vmem [thread:$0]  %s719_s5, 512, %s60_s17, [#allocation9], %s580_s11, %s580_s11, %s581_s12  }
  0x44   :  { %571 = dma.done.wait [#allocation3], 64  }
  0x45   :  { %572 = vsyncadd [#allocation3], 4294967232 }
  0x46   :  { %573 = dma.done.wait [#allocation6], 1024  }
  0x47   :  { %574 = vsyncadd [#allocation6], 4294966272 }
  0x48   :  { %575 = dma.done.wait [#allocation9], 512  }
  0x49   :  { %576 = vsyncadd [#allocation9], 4294966784  ;;  %v585_v0 = vmov 0.0   ;;  %vm586_vm0 = vmmov 0   ;;  %v445_v1 = vld [vmem:[#allocation5] sm:$0xff]   ;;  %v446_v2 = vld [vmem:[#allocation5 + $0x8] sm:$0xff]   ;;  %v333_v30 = vlaneseq }
  0x4a   :  { %400 = vmatprep.subr.bf16.mxu0 %v585_v0  ;;  %408 = vmatprep.mubr.msk.bf16.mxu0 %vm586_vm0, %v585_v0  ;;  %v449_v3 = vld [vmem:[#allocation7] sm:$0xff]   ;;  %v447_v4 = vld [vmem:[#allocation5 + $0x10] sm:$0xff]   ;;  %v450_v5 = vld [vmem:[#allocation7 + $0x8] sm:$0xff]   ;;  %vm121_vm1 = vcmask 523264  }
  0x4b   :  { %412 = vmatprep.subr.bf16.mxu1 %v585_v0  ;;  %420 = vmatprep.mubr.msk.bf16.mxu1 %vm586_vm0, %v585_v0  ;;  %v448_v6 = vld [vmem:[#allocation5 + $0x18] sm:$0xff]   ;;  %v451_v8 = vld [vmem:[#allocation7 + $0x10] sm:$0xff]   ;;  %v453_v10 = vld [vmem:[#allocation8] sm:$0xff]   ;;  %v334_v31 = vand.u32 127, %v333_v30 }
  0x4c   :  { %401 = vmatpush3.bf16.msra.mxu0 %v445_v1  ;;  %413 = vmatpush3.bf16.msra.mxu1 %v449_v3  ;;  %v81_v7 = vld [vmem:[#allocation2] sm:$0xf]  ;;  %v454_v11 = vld [vmem:[#allocation8 + $0x8] sm:$0xff]   ;;  %v455_v20 = vld [vmem:[#allocation8 + $0x10] sm:$0xff]  }
  0x4d   :  { %402 = vmatprep.subr.bf16.mxu0 %v585_v0  ;;  %414 = vmatprep.subr.bf16.mxu1 %v585_v0  ;;  %v452_v9 = vld [vmem:[#allocation7 + $0x18] sm:$0xff]   ;;  %vm335_vm2 = vcmp.lt.s32.totalorder %v334_v31, 4 }
  0x4e   :  { %v367_v12 = vld [vmem:[%s716_s2] ss:$0 sm:$0xff] }
  0x4f   :  { %v456_v21 = vld [vmem:[#allocation8 + $0x18] sm:$0xff]  }
  0x50   :  { %403 = vmatpush3.bf16.msra.mxu0 %v446_v2  ;;  %415 = vmatpush3.bf16.msra.mxu1 %v450_v5  ;;  %v373_v22 = vld [vmem:[%s718_s4] ss:$0 sm:$0xff]  ;;  %s587_s4 = smov [#allocation10]  }
  0x51   :  { %404 = vmatprep.subr.bf16.mxu0 %v585_v0  ;;  %416 = vmatprep.subr.bf16.mxu1 %v585_v0  ;;  %v379_v32 = vld [vmem:[%s720_s6] ss:$0 sm:$0xff]  ;;  %s356_s6 = sshll.u32 %s587_s4, 4  ;;  %s357_s6 = int_to_ptr.vmem [resolvable:$true] %s356_s6 }
  0x52   :  { %s549_s28 = scalar_lea.vmem %s357_s6, 128  ;;  %p554_p5 = scmp.lt.s32.totalorder %s357_s6, %s357_s6 }
  0x53   :  { %p550_p4 = scmp.ne.s32.totalorder %s357_s6, %s549_s28  ;;  %p555_p6 = scmp.lt.s32.totalorder %s549_s28, %s549_s28 }
  0x54   :  { %405 = vmatpush3.bf16.msra.mxu0 %v447_v4  ;;  %417 = vmatpush3.bf16.msra.mxu1 %v451_v8 }
  0x55   :  { %406 = vmatprep.subr.bf16.mxu0 %v585_v0  ;;  %418 = vmatprep.subr.bf16.mxu1 %v585_v0  ;;  %p556_p7 = por %p555_p6, %p554_p5 }
  0x57   :  { %p557_p8 = pnand %p556_p7, %p550_p4 }
  0x58   :  { %407 = vmatpush3.bf16.msra.mxu0 %v448_v6  ;;  %419 = vmatpush3.bf16.msra.mxu1 %v452_v9 }
  0x59   :  { %424 = vmatprep.subr.bf16.mxu0 %v585_v0 }
  0x5b   :  { %409 = vmatmul.mubr.msk.bf16.vlgmr.msra.gmra.mrb[0].mxu0 %vm121_vm1, %v81_v7 }
  0x5c   :  { %432 = vmatprep.mubr.msk.bf16.mxu0 %vm586_vm0, %v585_v0  ;;  %425 = vmatpush3.bf16.msra.mxu0 %v453_v10 }
  0x5d   :  { %426 = vmatprep.subr.bf16.mxu0 %v585_v0 }
  0x60   :  { %427 = vmatpush3.bf16.msra.mxu0 %v454_v11 }
  0x61   :  { %428 = vmatprep.subr.bf16.mxu0 %v585_v0 }
  0x64   :  { %429 = vmatpush3.bf16.msra.mxu0 %v455_v20 }
  0x65   :  { %430 = vmatprep.subr.bf16.mxu0 %v585_v0 }
  0x68   :  { %431 = vmatpush3.bf16.msra.mxu0 %v456_v21 }
 0x12e   :  { %v159_v13 = vpop.f32.mrb[0].mxu0 }
 0x12f   :  { %v160_v14 = vadd.f32 %v367_v12, %v159_v13  ;;  %v410_v15 = vpop.f32.mrb[1].mxu0 }
 0x130   :  { %v162_v16 = vpop.f32.mrb[2].mxu0 }
 0x131   :  { %v165_v17 = vmax.f32 %v160_v14, 0.0  ;;  %v411_v18 = vpop.f32.mrb[3].mxu0 }
 0x133   :  { %v166_v19 = vpack.c.bf16 %v165_v17, %v165_v17 }
 0x135   :  { %421 = vmatmul.mubr.msk.bf16.vlgmr.msra.gmra.mrb[0].mxu1 %vm121_vm1, %v166_v19 }
 0x208   :  { %v243_v23 = vpop.f32.mrb[0].mxu1 }
 0x209   :  { %v244_v24 = vadd.f32 %v373_v22, %v243_v23  ;;  %v422_v25 = vpop.f32.mrb[1].mxu1 }
 0x20a   :  { %v246_v26 = vpop.f32.mrb[2].mxu1 }
 0x20b   :  { %v249_v27 = vmax.f32 %v244_v24, 0.0  ;;  %v423_v28 = vpop.f32.mrb[3].mxu1 }
 0x20d   :  { %v250_v29 = vpack.c.bf16 %v249_v27, %v249_v27 }
 0x20f   :  { %433 = vmatmul.mubr.msk.bf16.vlgmr.msra.gmra.mrb[4].mxu0 %vm121_vm1, %v250_v29 }
 0x2e2   :  { %v327_v33 = vpop.f32.mrb[4].mxu0 }
 0x2e3   :  { %v328_v34 = vadd.f32 %v379_v32, %v327_v33  ;;  %v434_v35 = vpop.f32.mrb[5].mxu0 }
 0x2e4   :  { %v330_v36 = vpop.f32.mrb[6].mxu0 }
 0x2e5   :  { %v435_v37 = vpop.f32.mrb[7].mxu0  ;;  %v336_v38 = vsel %vm335_vm2, %v328_v34, -inf }
 0x2e6   :  { %337 = vmax.xlane.f32.xlu0 %v336_v38 }
 0x373   :  { %v338_v39 = vpop.xlane.xlu0 %337 }
 0x374   :  { %v339_v40 = vsub.f32 %v336_v38, %v338_v39 }
 0x376   :  { %v340_v41 = vmul.f32 1.442695, %v339_v40 }
 0x378   :  { %457 = vpow2.f32 %v340_v41 }
 0x382   :  { %v458_v42 = vpop.eup %457 }
 0x383   :  { %342 = vadd.xlane.f32.xlu0 %v458_v42 }
 0x410   :  { %v343_v43 = vpop.xlane.xlu0 %342 }
 0x411   :  { %459 = vlog2.f32 %v343_v43 }
 0x41b   :  { %v460_v44 = vpop.eup %459 }
 0x41c   :  { %v345_v45 = vmul.f32 0.6931472, %v460_v44 }
 0x41e   :  { %v346_v46 = vadd.f32 %v345_v45, %v338_v39 }
 0x420   :  { %v347_v47 = vsub.f32 %v328_v34, %v346_v46 }
 0x422   :  { %v348_v48 = vsel %vm335_vm2, %v347_v47, %v328_v34 }
 0x423   :  { %349 = vst [vmem:[#allocation10] sm:$0xff] %v348_v48 }
 0x424   :  { %560 = shalt.err (!%p557_p8)
}
 0x425   :  { %s561_s8 = scalar_lea.hbm %s721_s7, 128 }
 0x426   :  { %p562_p9 = scmp.ne.s32.totalorder %s721_s7, %s561_s8  ;;  %p565_p10 = scmp.lt.u32.totalorder %s561_s8, %s721_s7 }
 0x428   :  { %p567_p11 = pnand %p565_p10, %p562_p9 }
 0x42a   :  { %570 = shalt.err (!%p567_p11)
}
 0x42b   :  { %359 = dma.vmem_to_hbm [thread:$0]  %s357_s6, 128, %s721_s7, [#allocation4]  }
 0x42c   :  { %577 = dma.done.wait [#allocation4], 128  }
 0x42d   :  { %578 = vsyncadd [#allocation4], 4294967168 }
 0x42e   :  { %363 = vsyncpa [#allocation3], 1 }
 0x42f   :  { %364 = vsyncpa [#allocation6], 1 }
 0x430   :  { %365 = vsyncpa [#allocation9], 1 }
 0x431   :  { %366 = vsyncpa [#allocation4], 1 }

</bundles_post_ra>
